<compile_context>
chip_gen: v7x
topology: tpu7x:2x2x1
jax: 0.10.0
libtpu: 0.0.40
codegen_flags: <defaults>
</compile_context>

<pallas_src>
import jax
import jax.numpy as jnp
from jax.experimental import pallas as pl
from jax.experimental.pallas import tpu as pltpu


def _maxpool_reduce_kernel(x_ref, o_ref):
    # x_ref: (TB, N, TF) tile; o_ref: (TB, TF).  Cross-sublane max over N.
    o_ref[...] = jnp.max(x_ref[...], axis=1)


def _maxpool_accum_kernel(x_ref, o_ref):
    # x_ref: (TB, TF) -- one image slab (N axis squeezed); o_ref: (TB, TF).
    # Pure VPU elementwise accumulate over the (last, "arbitrary") N grid axis.
    n = pl.program_id(2)

    @pl.when(n == 0)
    def _():
        o_ref[...] = x_ref[...]

    @pl.when(n > 0)
    def _():
        o_ref[...] = jnp.maximum(o_ref[...], x_ref[...])


def _round_up(x, m):
    return ((x + m - 1) // m) * m


def _pick_tb(B, sub, bytes_per_row, budget_bytes):
    """Largest sublane-aligned batch tile whose footprint fits the budget."""
    tb = (budget_bytes // bytes_per_row) // sub * sub
    tb = max(sub, tb)
    if B <= tb:
        return B  # single batch tile; full-extent block is always layout-legal
    return tb     # multiple of sub; last (ragged) block handled by Pallas


def max_pool_images(x):
    """x: (B, N, F) -> (B, F), max over the N (images) axis."""
    B, N, F = x.shape
    dtype = x.dtype
    itemsize = jnp.dtype(dtype).itemsize

    # Sublane granularity for this dtype (f32: 8, bf16: 16, int8/fp8: 32).
    sub = max(8, 32 // itemsize)

    # --- generation-dependent VMEM budgets (trace-time hardware query). ---
    try:
        vmem_cap = pltpu.get_tpu_info().vmem_capacity_bytes
    except Exception:
        vmem_cap = 64 * 1024 * 1024  # conservative (v7x-like) fallback
    big_vmem = vmem_cap >= 100 * 1024 * 1024  # v5e / v6e: 128 MiB VMEM
    if big_vmem:
        tile_budget = 48 * 1024 * 1024
        vmem_limit = 80 * 1024 * 1024
    else:  # v7x: 64 MiB physical / 32 MiB scoped
        tile_budget = 24 * 1024 * 1024
        vmem_limit = 32 * 1024 * 1024

    # --- lane tiling of F: full F unless large and 128-divisible. ---
    if F % 128 == 0 and F > 4096:
        TF = 4096
        while F % TF != 0:
            TF -= 128
        if TF * itemsize < 2048:  # guard: don't collapse to tiny strided DMAs
            TF = F
    else:
        TF = F  # full-extent block is always legal
    TFp = _round_up(TF, 128)       # lane-padded width in VMEM
    Np = _round_up(N, sub)         # sublane-padded N in VMEM

    bytes_accessed = (B * N * F + B * F) * itemsize
    cost = pl.CostEstimate(flops=0, transcendentals=0,
                           bytes_accessed=bytes_accessed)

    # v7x only: small-N cross-sublane reduce can saturate the 2 XLUs against
    # 3.2 TB/s HBM -> switch to an N-grid-axis VPU accumulate.  Keep per-row
    # DMA chunks >= 2 KiB so the strided reads stay efficient.
    use_accum = (not big_vmem) and (N <= 16) and (TF * itemsize >= 2048)

    if use_accum:
        # Double-buffered input slab + resident/revisited output slab.
        bytes_per_row = 4 * TFp * itemsize
        TB = _pick_tb(B, sub, bytes_per_row, tile_budget)
        grid = (pl.cdiv(B, TB), F // TF, N)
        return pl.pallas_call(
            _maxpool_accum_kernel,
            out_shape=jax.ShapeDtypeStruct((B, F), dtype),
            grid=grid,
            in_specs=[pl.BlockSpec((TB, pl.Squeezed(), TF),
                                   lambda b, f, n: (b, n, f))],
            out_specs=pl.BlockSpec((TB, TF), lambda b, f, n: (b, f)),
            compiler_params=pltpu.CompilerParams(
                dimension_semantics=("parallel", "parallel", "arbitrary"),
                vmem_limit_bytes=vmem_limit,
            ),
            cost_estimate=cost,
        )(x)

    # Default single-block-over-N form (v5e/v6e, and v7x with large N/F).
    # Footprint: double-buffered (sublane-padded) input block + output block.
    bytes_per_row = 2 * (Np + 1) * TFp * itemsize
    TB = _pick_tb(B, sub, bytes_per_row, tile_budget)
    grid = (pl.cdiv(B, TB), F // TF)
    return pl.pallas_call(
        _maxpool_reduce_kernel,
        out_shape=jax.ShapeDtypeStruct((B, F), dtype),
        grid=grid,
        in_specs=[pl.BlockSpec((TB, N, TF), lambda b, f: (b, 0, f))],
        out_specs=pl.BlockSpec((TB, TF), lambda b, f: (b, f)),
        compiler_params=pltpu.CompilerParams(
            dimension_semantics=("parallel", "parallel"),
            vmem_limit_bytes=vmem_limit,
        ),
        cost_estimate=cost,
    )(x)


if __name__ == "__main__":
    key = jax.random.PRNGKey(0)
    B, NBR_IMAGES, F = 2, 12, 128  # MaxPoolImages(nbr_images=12)
    x = jax.random.normal(key, (B, NBR_IMAGES, F), dtype=jnp.float32)

    out = jax.block_until_ready(max_pool_images(x))

    # Reference check against plain JAX (same semantics as the torch module).
    ref = jnp.max(x, axis=1)
    assert out.shape == (B, F)
    assert jnp.allclose(out, ref), "mismatch vs reference"

    print("KERNEL_OK")
</pallas_src>

<mosaic_0001>
module attributes {stable_mosaic.version = 11 : i64} {
  func.func @_maxpool_reduce_kernel(%arg0: i32, %arg1: i32, %arg2: memref<2x12x128xf32, #tpu.memory_space<vmem>>, %arg3: memref<2x128xf32, #tpu.memory_space<vmem>>) attributes {dimension_semantics = [#tpu.dimension_semantics<parallel>, #tpu.dimension_semantics<parallel>], iteration_bounds = array<i64: 1, 1>, scalar_prefetch = 0 : i64, scratch_operands = 0 : i64, tpu.core_type = #tpu.core_type<tc>, window_params = [{transform_indices = @transform_0, window_bounds = array<i64: 2, 12, 128>}, {transform_indices = @transform_1, window_bounds = array<i64: 2, 128>}]} {
    %c0 = arith.constant 0 : index
    %c0_0 = arith.constant 0 : index
    %c0_1 = arith.constant 0 : index
    %0 = vector.load %arg2[%c0, %c0_0, %c0_1] : memref<2x12x128xf32, #tpu.memory_space<vmem>>, vector<2x12x128xf32>
    %cst = arith.constant dense<0xFF800000> : vector<2x128xf32>
    %1 = vector.multi_reduction <maximumf>, %0, %cst [1] : vector<2x12x128xf32> to vector<2x128xf32>
    %c0_2 = arith.constant 0 : index
    %c0_3 = arith.constant 0 : index
    %2 = vector.load %arg3[%c0_2, %c0_3] : memref<2x128xf32, #tpu.memory_space<vmem>>, vector<2x128xf32>
    tpu.vector_store %arg3[%c0_2, %c0_3], %1 {strides = array<i32>} : memref<2x128xf32, #tpu.memory_space<vmem>>, vector<2x128xf32>,
    return
  }
  func.func @transform_0(%arg0: i32, %arg1: i32) -> (i32, i32, i32) {
    %c0_i32 = arith.constant 0 : i32
    %c0_i32_0 = arith.constant 0 : i32
    return %arg0, %c0_i32, %arg1 : i32, i32, i32
  }
  func.func @transform_1(%arg0: i32, %arg1: i32) -> (i32, i32) {
    %c0_i32 = arith.constant 0 : i32
    return %arg0, %arg1 : i32, i32
  }
}

</mosaic_0001>

<bundles_post_ra>
// kernel: tpu_custom_call.1
= control target key start
LH: loop header
LB: loop body
LE: loop exit
PB: predicated region body
PF: predicated region fallthrough
CT: control target
= control target key end

     0   :  { %vm13_vm0 = vcmask 1043456   ;;  %s110_s0 = inlined_call_operand.vmem [shape: f32[2,12,128], index: 0, kind: input, shape index: {}]   ;;  %s111_s1 = inlined_call_operand.hbm [shape: f32[2,128], index: 1, kind: output, shape index: {}]  }
   0x1   :  { %v9_v0 = vld [vmem:[%s110_s0] sm:$0xff]  ;;  %v10_v1 = vld [vmem:[%s110_s0 + $0x8] sm:$0xf]  ;;  %v11_v2 = vld [vmem:[%s110_s0 + $0x10] sm:$0xff] }
   0x2   :  { %v12_v3 = vld [vmem:[%s110_s0 + $0x18] sm:$0xf]  ;;  %v14_v4 = vsel %vm13_vm0, %v10_v1, -inf }
   0x3   :  { %6 = vsyncpa [#allocation3], 0  ;;  %v15_v5 = vmax.f32 %v9_v0, %v14_v4  ;;  %v22_v6 = vsel %vm13_vm0, %v12_v3, -inf  ;;  %s75_s14 = smov [#allocation2]   ;;  %vm32_vm1 = vcmask 1041409  }
   0x4   :  { %v23_v7 = vmax.f32 %v11_v2, %v22_v6  ;;  %s42_s15 = sshll.u32 %s75_s14, 4  ;;  %s43_s15 = int_to_ptr.vmem [resolvable:$true] %s42_s15 }
   0x5   :  { %v16_v8 = vrot.slane %v15_v5, 4  ;;  %s51_s0 = scalar_lea.vmem %s43_s15, 32  ;;  %p56_p1 = scmp.lt.s32.totalorder %s43_s15, %s43_s15 }
   0x6   :  { %v24_v9 = vrot.slane %v23_v7, 4  ;;  %p52_p0 = scmp.ne.s32.totalorder %s43_s15, %s51_s0  ;;  %p57_p2 = scmp.lt.s32.totalorder %s51_s0, %s51_s0 }
   0x7   :  { %v17_v10 = vmax.f32 %v15_v5, %v16_v8 }
   0x8   :  { %v25_v11 = vmax.f32 %v23_v7, %v24_v9  ;;  %p58_p3 = por %p57_p2, %p56_p1 }
   0x9   :  { %v18_v12 = vrot.slane %v17_v10, 2 }
   0xa   :  { %v26_v13 = vrot.slane %v25_v11, 2  ;;  %p59_p4 = pnand %p58_p3, %p52_p0 }
   0xb   :  { %v19_v14 = vmax.f32 %v17_v10, %v18_v12 }
   0xc   :  { %v27_v15 = vmax.f32 %v25_v11, %v26_v13 }
   0xd   :  { %v20_v16 = vrot.slane %v19_v14, 1 }
   0xe   :  { %v28_v17 = vrot.slane %v27_v15, 1 }
   0xf   :  { %v21_v18 = vmax.f32 %v19_v14, %v20_v16 }
  0x10   :  { %v29_v19 = vmax.f32 %v27_v15, %v28_v17 }
  0x12   :  { %v33_v20 = vsel %vm32_vm1, %v29_v19, %v21_v18 }
  0x13   :  { %35 = vst [vmem:[#allocation2] sm:$0x3] %v33_v20 }
  0x14   :  { %62 = shalt.err (!%p59_p4)
}
  0x15   :  { %s63_s18 = scalar_lea.hbm %s111_s1, 32 }
  0x16   :  { %p64_p5 = scmp.ne.s32.totalorder %s111_s1, %s63_s18  ;;  %p67_p6 = scmp.lt.u32.totalorder %s63_s18, %s111_s1 }
  0x18   :  { %p69_p7 = pnand %p67_p6, %p64_p5 }
  0x1a   :  { %72 = shalt.err (!%p69_p7)
}
  0x1b   :  { %45 = dma.vmem_to_hbm [thread:$0]  %s43_s15, 32, %s111_s1, [#allocation3]  }
  0x1c   :  { %73 = dma.done.wait [#allocation3], 32  }
  0x1d   :  { %74 = vsyncadd [#allocation3], 4294967264 }
  0x1e   :  { %49 = vsyncpa [#allocation3], 1 }

</bundles_post_ra>
